<compile_context>
chip_gen: v7x
topology: tpu7x:2x2x1
jax: 0.10.0
libtpu: 0.0.40
codegen_flags: <defaults>
</compile_context>

<pallas_src>
import functools

import jax
import jax.numpy as jnp
from jax.experimental import pallas as pl
from jax.experimental.pallas import tpu as pltpu


def _mlp_kernel(x_ref, w1_ref, w2_ref, w3_ref, o_ref, *, norm: bool):
    # Layer 0: Linear (MXU, f32 accumulate) + ReLU
    h = jnp.dot(x_ref[...], w1_ref[...], preferred_element_type=jnp.float32)
    h = jnp.maximum(h, 0.0)

    # Layer 1: Linear + ReLU (cast activations back to the weight dtype so bf16
    # weights keep the MXU on its native bf16 path; identity for f32).
    h = jnp.dot(h.astype(w2_ref.dtype), w2_ref[...],
                preferred_element_type=jnp.float32)
    h = jnp.maximum(h, 0.0)

    # Layer 2: Linear (+ optional FeatureNorm; Identity when norm=False)
    out = jnp.dot(h.astype(w3_ref.dtype), w3_ref[...],
                  preferred_element_type=jnp.float32)
    if norm:
        # FeatureNorm: x / ||x||_2 along last axis — no eps, matching torch
        # exactly (an all-zero row produces NaN in torch as well).
        inv = jax.lax.rsqrt(jnp.sum(out * out, axis=-1, keepdims=True))
        out = out * inv

    o_ref[...] = out.astype(o_ref.dtype)


def _num_tensorcores_default():
    """1 for single-TC chips (v5e/v6e), 2 for dual-TC / megacore chips."""
    try:
        kind = jax.devices()[0].device_kind.lower()
    except Exception:
        return 1
    if "lite" in kind or "v5e" in kind or "v6e" in kind or "v6 lite" in kind:
        return 1
    if "v7" in kind or "v4" in kind or "v5p" in kind:
        return 2
    return 1


def _sublane_quantum(dtype):
    # Sub-32-bit dtypes pack rows along sublanes: bf16 -> 16, int8/fp8 -> 32.
    itemsize = jnp.dtype(dtype).itemsize
    return {4: 8, 2: 16, 1: 32}.get(itemsize, 8)


def _vmem_estimate_bytes(tile, dim_in, dim_hidden, dim_out,
                         in_itemsize, out_itemsize):
    # Double-buffered in/out tiles + f32 intermediates + resident weights.
    io = 2 * tile * dim_in * in_itemsize + 2 * tile * dim_out * out_itemsize
    inter = 3 * tile * dim_hidden * 4
    w = 2 * (dim_in * dim_hidden + dim_hidden * dim_hidden
             + dim_hidden * dim_out) * in_itemsize
    return io + inter + w


def semantic_model_forward(x, w1_t, w2_t, w3_t, *, norm=False, tile_n=4096,
                           out_dtype=None, num_tensorcores=None,
                           vmem_budget_bytes=24 * 1024 * 1024):
    """Fused 3-layer MLP forward.

    x:     [N, dim_in]
    w*_t:  transposed torch Linear weights, i.e. shape [in, out].
    """
    N, dim_in = x.shape
    dim_hidden = w1_t.shape[1]
    dim_out = w3_t.shape[1]
    out_dtype = out_dtype if out_dtype is not None else x.dtype

    # ---- generation-aware row-tile selection --------------------------------
    if num_tensorcores is None:
        num_tensorcores = _num_tensorcores_default()
    quantum = _sublane_quantum(x.dtype)

    # Aim for at least `num_tensorcores` grid steps (so v7x / megacore chips
    # keep both TCs busy), but never split a small N on a single-TC chip.
    target = max(1, -(-N // num_tensorcores))
    tile = min(int(tile_n), target)
    tile = -(-tile // quantum) * quantum
    tile = max(tile, quantum)

    in_itemsize = jnp.dtype(x.dtype).itemsize
    out_itemsize = jnp.dtype(out_dtype).itemsize
    # Cap the tile so double-buffered tiles + activations fit the VMEM budget.
    while (_vmem_estimate_bytes(tile, dim_in, dim_hidden, dim_out,
                                in_itemsize, out_itemsize) > vmem_budget_bytes
           and tile > quantum):
        tile = max(quantum, ((tile // 2) // quantum) * quantum)

    grid_n = pl.cdiv(N, tile)   # ragged final block handled by Mosaic; no pad

    est = _vmem_estimate_bytes(tile, dim_in, dim_hidden, dim_out,
                               in_itemsize, out_itemsize)
    vmem_limit = int(min(48 * 1024 * 1024, max(32 * 1024 * 1024, 2 * est)))

    kernel = functools.partial(_mlp_kernel, norm=norm)

    # TODO(synk): if profiling at small tiles shows exposed input DMA, add
    # pipeline_mode=pl.Buffered(3) on the x BlockSpec only (sweep, don't assume).
    return pl.pallas_call(
        kernel,
        out_shape=jax.ShapeDtypeStruct((N, dim_out), out_dtype),
        grid_spec=pltpu.PrefetchScalarGridSpec(
            num_scalar_prefetch=0,
            grid=(grid_n,),
            in_specs=[
                pl.BlockSpec((tile, dim_in), lambda i: (i, 0)),
                pl.BlockSpec((dim_in, dim_hidden), lambda i: (0, 0)),
                pl.BlockSpec((dim_hidden, dim_hidden), lambda i: (0, 0)),
                pl.BlockSpec((dim_hidden, dim_out), lambda i: (0, 0)),
            ],
            out_specs=pl.BlockSpec((tile, dim_out), lambda i: (i, 0)),
        ),
        compiler_params=pltpu.CompilerParams(
            dimension_semantics=("parallel",),
            vmem_limit_bytes=vmem_limit),
    )(x, w1_t, w2_t, w3_t)


def xavier_uniform(key, fan_out, fan_in, dtype=jnp.float32):
    # Matches torch.nn.init.xavier_uniform_ on a (fan_out, fan_in) weight.
    bound = jnp.sqrt(6.0 / (fan_in + fan_out))
    return jax.random.uniform(key, (fan_out, fan_in), dtype=dtype,
                              minval=-bound, maxval=bound)


if __name__ == "__main__":
    # Module defaults: dim_in=64, dim_hidden=128, dim_out=40, num_layer=3,
    # use_bias=False, norm=False.
    dim_in, dim_hidden, dim_out = 64, 128, 40
    N = 300  # deliberately ragged: exercises the partial-final-block path

    key = jax.random.PRNGKey(0)
    kx, k1, k2, k3 = jax.random.split(key, 4)

    x = jax.random.normal(kx, (N, dim_in), dtype=jnp.float32)

    # torch.nn.Linear weights are (out, in); init like xavier_uniform_, then
    # transpose to (in, out) for the kernel.
    w1 = xavier_uniform(k1, dim_hidden, dim_in)
    w2 = xavier_uniform(k2, dim_hidden, dim_hidden)
    w3 = xavier_uniform(k3, dim_out, dim_hidden)

    # Pure-JAX reference of the same forward pass (f32).
    ref = jnp.maximum(x @ w1.T, 0.0)
    ref = jnp.maximum(ref @ w2.T, 0.0)
    ref = ref @ w3.T
    ref_norm = ref / jnp.linalg.norm(ref, axis=-1, keepdims=True)

    # ---- f32, norm=False (module default), single large tile -----------------
    out = semantic_model_forward(x, w1.T, w2.T, w3.T, norm=False)
    out = jax.block_until_ready(out)
    assert out.shape == (N, dim_out)
    assert jnp.allclose(out, ref, atol=1e-4, rtol=1e-4), "f32 mismatch vs reference"

    # ---- f32, norm=True (FeatureNorm path) ------------------------------------
    out_n = semantic_model_forward(x, w1.T, w2.T, w3.T, norm=True)
    out_n = jax.block_until_ready(out_n)
    assert jnp.allclose(out_n, ref_norm, atol=1e-4, rtol=1e-4), "norm mismatch"

    # ---- f32, forced multi-step grid with a ragged tail (300 rows, 128 tile) --
    out_multi = semantic_model_forward(x, w1.T, w2.T, w3.T, norm=False,
                                       tile_n=128)
    out_multi = jax.block_until_ready(out_multi)
    assert jnp.allclose(out_multi, ref, atol=1e-4, rtol=1e-4), "ragged-grid mismatch"

    # ---- bf16 inputs/weights (halved HBM read traffic), f32 accumulate/output -
    out_bf = semantic_model_forward(
        x.astype(jnp.bfloat16), w1.T.astype(jnp.bfloat16),
        w2.T.astype(jnp.bfloat16), w3.T.astype(jnp.bfloat16),
        norm=False, out_dtype=jnp.float32)
    out_bf = jax.block_until_ready(out_bf)
    assert out_bf.shape == (N, dim_out)
    assert bool(jnp.all(jnp.isfinite(out_bf)))
    assert jnp.allclose(out_bf, ref, atol=0.1, rtol=0.1), "bf16 drifted too far"

    print("KERNEL_OK")
</pallas_src>

<mosaic_0001>
module attributes {stable_mosaic.version = 11 : i64} {
  func.func @_mlp_kernel(%arg0: i32, %arg1: memref<304x64xf32, #tpu.memory_space<vmem>>, %arg2: memref<64x128xf32, #tpu.memory_space<vmem>>, %arg3: memref<128x128xf32, #tpu.memory_space<vmem>>, %arg4: memref<128x40xf32, #tpu.memory_space<vmem>>, %arg5: memref<304x40xf32, #tpu.memory_space<vmem>>) attributes {dimension_semantics = [#tpu.dimension_semantics<parallel>], iteration_bounds = array<i64: 1>, scalar_prefetch = 0 : i64, scratch_operands = 0 : i64, tpu.core_type = #tpu.core_type<tc>, window_params = [{transform_indices = @transform_0, window_bounds = array<i64: 304, 64>}, {pipeline_mode = #tpu.pipeline_mode<synchronous>, transform_indices = @transform_1, window_bounds = array<i64: 64, 128>}, {pipeline_mode = #tpu.pipeline_mode<synchronous>, transform_indices = @transform_2, window_bounds = array<i64: 128, 128>}, {pipeline_mode = #tpu.pipeline_mode<synchronous>, transform_indices = @transform_3, window_bounds = array<i64: 128, 40>}, {transform_indices = @transform_4, window_bounds = array<i64: 304, 40>}]} {
    %c0 = arith.constant 0 : index
    %c0_0 = arith.constant 0 : index
    %0 = vector.load %arg1[%c0, %c0_0] : memref<304x64xf32, #tpu.memory_space<vmem>>, vector<304x64xf32>
    %c0_1 = arith.constant 0 : index
    %c0_2 = arith.constant 0 : index
    %1 = vector.load %arg2[%c0_1, %c0_2] : memref<64x128xf32, #tpu.memory_space<vmem>>, vector<64x128xf32>
    %cst = arith.constant dense<0.000000e+00> : vector<304x128xf32>
    %2 = tpu.matmul %0, %1, %cst {dimension_numbers = #tpu.dot_dimension_numbers<[1], [0], [0], [1], [0, 0, 1, 1], [], []>} : vector<304x64xf32>, vector<64x128xf32>, vector<304x128xf32> -> vector<304x128xf32>
    %cst_3 = arith.constant 0.000000e+00 : f32
    %3 = vector.broadcast %cst_3 : f32 to vector<304x128xf32>
    %4 = arith.maximumf %2, %3 : vector<304x128xf32>
    %c0_4 = arith.constant 0 : index
    %c0_5 = arith.constant 0 : index
    %5 = vector.load %arg3[%c0_4, %c0_5] : memref<128x128xf32, #tpu.memory_space<vmem>>, vector<128x128xf32>
    %cst_6 = arith.constant dense<0.000000e+00> : vector<304x128xf32>
    %6 = tpu.matmul %4, %5, %cst_6 {dimension_numbers = #tpu.dot_dimension_numbers<[1], [0], [0], [1], [0, 0, 1, 1], [], []>} : vector<304x128xf32>, vector<128x128xf32>, vector<304x128xf32> -> vector<304x128xf32>
    %cst_7 = arith.constant 0.000000e+00 : f32
    %7 = vector.broadcast %cst_7 : f32 to vector<304x128xf32>
    %8 = arith.maximumf %6, %7 : vector<304x128xf32>
    %c0_8 = arith.constant 0 : index
    %c0_9 = arith.constant 0 : index
    %9 = vector.load %arg4[%c0_8, %c0_9] : memref<128x40xf32, #tpu.memory_space<vmem>>, vector<128x40xf32>
    %cst_10 = arith.constant dense<0.000000e+00> : vector<304x40xf32>
    %10 = tpu.matmul %8, %9, %cst_10 {dimension_numbers = #tpu.dot_dimension_numbers<[1], [0], [0], [1], [0, 0, 1, 1], [], []>} : vector<304x128xf32>, vector<128x40xf32>, vector<304x40xf32> -> vector<304x40xf32>
    %c0_11 = arith.constant 0 : index
    %c0_12 = arith.constant 0 : index
    %11 = vector.load %arg5[%c0_11, %c0_12] : memref<304x40xf32, #tpu.memory_space<vmem>>, vector<304x40xf32>
    tpu.vector_store %arg5[%c0_11, %c0_12], %10 {strides = array<i32>} : memref<304x40xf32, #tpu.memory_space<vmem>>, vector<304x40xf32>,
    return
  }
  func.func @transform_0(%arg0: i32) -> (i32, i32) {
    %c0_i32 = arith.constant 0 : i32
    %c0_i32_0 = arith.constant 0 : i32
    return %arg0, %c0_i32 : i32, i32
  }
  func.func @transform_1(%arg0: i32) -> (i32, i32) {
    %c0_i32 = arith.constant 0 : i32
    %c0_i32_0 = arith.constant 0 : i32
    %c0_i32_1 = arith.constant 0 : i32
    return %c0_i32, %c0_i32_0 : i32, i32
  }
  func.func @transform_2(%arg0: i32) -> (i32, i32) {
    %c0_i32 = arith.constant 0 : i32
    %c0_i32_0 = arith.constant 0 : i32
    %c0_i32_1 = arith.constant 0 : i32
    return %c0_i32, %c0_i32_0 : i32, i32
  }
  func.func @transform_3(%arg0: i32) -> (i32, i32) {
    %c0_i32 = arith.constant 0 : i32
    %c0_i32_0 = arith.constant 0 : i32
    %c0_i32_1 = arith.constant 0 : i32
    return %c0_i32, %c0_i32_0 : i32, i32
  }
  func.func @transform_4(%arg0: i32) -> (i32, i32) {
    %c0_i32 = arith.constant 0 : i32
    %c0_i32_0 = arith.constant 0 : i32
    return %arg0, %c0_i32 : i32, i32
  }
}

</mosaic_0001>

<bundles_post_ra>
// kernel: tpu_custom_call.1
= control target key start
LH: loop header
LB: loop body
LE: loop exit
PB: predicated region body
PF: predicated region fallthrough
CT: control target
= control target key end

     0   :  { %vm63_vm0 = vcmask 523264   ;;  %vm1051_vm1 = vcmask 326656   ;;  %s2101_s1 = inlined_call_operand.vmem [shape: f32[64,128], index: 1, kind: input, shape index: {}]   ;;  %s2102_s0 = inlined_call_operand.vmem [shape: f32[300,64], index: 0, kind: input, shape index: {}]   ;;  %s2103_s2 = inlined_call_operand.vmem [shape: f32[128,128], index: 2, kind: input, shape index: {}]   ;;  %s2104_s3 = inlined_call_operand.vmem [shape: f32[128,40], index: 3, kind: input, shape index: {}]   ;;  %s2105_s4 = inlined_call_operand.vmem [shape: f32[300,40], index: 4, kind: output, shape index: {}]  }
   0x1   :  { %v55_v0 = vld [vmem:[%s2101_s1] sm:$0xff]  ;;  %v56_v1 = vld [vmem:[%s2101_s1 + $0x8] sm:$0xff]  ;;  %v57_v2 = vld [vmem:[%s2101_s1 + $0x10] sm:$0xff] }
   0x2   :  { %v1537_v3 = vpack.c.bf16 %v56_v1, %v55_v0  ;;  %v58_v4 = vld [vmem:[%s2101_s1 + $0x18] sm:$0xff]  ;;  %v59_v6 = vld [vmem:[%s2101_s1 + $0x20] sm:$0xff]  ;;  %v60_v7 = vld [vmem:[%s2101_s1 + $0x28] sm:$0xff] }
   0x3   :  { %v1541_v5 = vpack.c.bf16 %v58_v4, %v57_v2  ;;  %v17_v8 = vld [vmem:[%s2102_s0] sm:$0xff]  ;;  %v1545_v9 = vpack.c.bf16 %v60_v7, %v59_v6  ;;  %v61_v10 = vld [vmem:[%s2101_s1 + $0x30] sm:$0xff]  ;;  %v62_v11 = vld [vmem:[%s2101_s1 + $0x38] sm:$0xff] }
   0x4   :  { %1538 = vmatprep.subr.bf16.mxu0 %v1537_v3  ;;  %1302 = vmatprep.mubr.msk.f32.mxu0 %vm63_vm0, %v17_v8  ;;  %v1549_v12 = vpack.c.bf16 %v62_v11, %v61_v10  ;;  %v37_v13 = vld [vmem:[%s2102_s0 + $0xa0] sm:$0xff]  ;;  %v472_v15 = vld [vmem:[%s2103_s2 + $0x8] sm:$0xff]  ;;  %v473_v18 = vld [vmem:[%s2103_s2 + $0x10] sm:$0xff] }
   0x5   :  { %1540 = vmatpush3.bf16.msra.mxu0 %v1537_v3  ;;  %1617 = vmatprep.subr.bf16.mxu1 %v1537_v3  ;;  %v471_v14 = vld [vmem:[%s2103_s2] sm:$0xff]  ;;  %v18_v16 = vld [vmem:[%s2102_s0 + $0x8] sm:$0xff]  ;;  %v474_v19 = vld [vmem:[%s2103_s2 + $0x18] sm:$0xff] }
   0x6   :  { %1542 = vmatprep.subr.bf16.mxu0 %v1541_v5  ;;  %1621 = vmatpush3.bf16.msra.mxu1 %v1537_v3  ;;  %v1553_v17 = vpack.c.bf16 %v472_v15, %v471_v14  ;;  %v19_v20 = vld [vmem:[%s2102_s0 + $0x10] sm:$0xff]  ;;  %v38_v21 = vld [vmem:[%s2102_s0 + $0xa8] sm:$0xff]  ;;  %v1557_v23 = vpack.c.bf16 %v474_v19, %v473_v18  ;;  %v475_v24 = vld [vmem:[%s2103_s2 + $0x20] sm:$0xff] }
   0x7   :  { %1618 = vmatprep.subr.bf16.mxu1 %v1541_v5  ;;  %1332 = vmatprep.mubr.msk.f32.mxu1 %vm63_vm0, %v37_v13  ;;  %v39_v22 = vld [vmem:[%s2102_s0 + $0xb0] sm:$0xff]  ;;  %v476_v25 = vld [vmem:[%s2103_s2 + $0x28] sm:$0xff]  ;;  %v20_v26 = vld [vmem:[%s2102_s0 + $0x18] sm:$0xff] }
   0x8   :  { %v21_v27 = vld [vmem:[%s2102_s0 + $0x20] sm:$0xff]  ;;  %v40_v28 = vld [vmem:[%s2102_s0 + $0xb8] sm:$0xff]  ;;  %v1561_v30 = vpack.c.bf16 %v476_v25, %v475_v24  ;;  %v477_v31 = vld [vmem:[%s2103_s2 + $0x30] sm:$0xff] }
   0x9   :  { %1544 = vmatpush3.bf16.msra.mxu0 %v1541_v5  ;;  %v41_v29 = vld [vmem:[%s2102_s0 + $0xc0] sm:$0xff]  ;;  %v478_v32 = vld [vmem:[%s2103_s2 + $0x38] sm:$0xff]  ;;  %v22_v33 = vld [vmem:[%s2102_s0 + $0x28] sm:$0xff] }
   0xa   :  { %1546 = vmatprep.subr.bf16.mxu0 %v1545_v9  ;;  %1622 = vmatpush3.bf16.msra.mxu1 %v1541_v5  ;;  %v23_v34 = vld [vmem:[%s2102_s0 + $0x30] sm:$0xff]  ;;  %v42_v35 = vld [vmem:[%s2102_s0 + $0xc8] sm:$0xff]  ;;  %v1565_v37 = vpack.c.bf16 %v478_v32, %v477_v31  ;;  %v479_v38 = vld [vmem:[%s2103_s2 + $0x40] sm:$0xff] }
   0xb   :  { %1619 = vmatprep.subr.bf16.mxu1 %v1545_v9  ;;  %v43_v36 = vld [vmem:[%s2102_s0 + $0xd0] sm:$0xff]  ;;  %v480_v39 = vld [vmem:[%s2103_s2 + $0x48] sm:$0xff]  ;;  %v24_v40 = vld [vmem:[%s2102_s0 + $0x38] sm:$0xff] }
   0xc   :  { %v25_v41 = vld [vmem:[%s2102_s0 + $0x40] sm:$0xff]  ;;  %v44_v42 = vld [vmem:[%s2102_s0 + $0xd8] sm:$0xff]  ;;  %v1569_v44 = vpack.c.bf16 %v480_v39, %v479_v38  ;;  %v481_v45 = vld [vmem:[%s2103_s2 + $0x50] sm:$0xff] }
   0xd   :  { %1548 = vmatpush3.bf16.msra.mxu0 %v1545_v9  ;;  %v45_v43 = vld [vmem:[%s2102_s0 + $0xe0] sm:$0xff]  ;;  %v482_v46 = vld [vmem:[%s2103_s2 + $0x58] sm:$0xff]  ;;  %v26_v47 = vld [vmem:[%s2102_s0 + $0x48] sm:$0xff] }
   0xe   :  { %1550 = vmatprep.subr.bf16.mxu0 %v1549_v12  ;;  %1623 = vmatpush3.bf16.msra.mxu1 %v1545_v9  ;;  %v27_v48 = vld [vmem:[%s2102_s0 + $0x50] sm:$0xff]  ;;  %v46_v49 = vld [vmem:[%s2102_s0 + $0xe8] sm:$0xff]  ;;  %v1573_v51 = vpack.c.bf16 %v482_v46, %v481_v45  ;;  %v483_v52 = vld [vmem:[%s2103_s2 + $0x60] sm:$0xff] }
   0xf   :  { %1620 = vmatprep.subr.bf16.mxu1 %v1549_v12  ;;  %v47_v50 = vld [vmem:[%s2102_s0 + $0xf0] sm:$0xff]  ;;  %v484_v53 = vld [vmem:[%s2103_s2 + $0x68] sm:$0xff]  ;;  %v28_v54 = vld [vmem:[%s2102_s0 + $0x58] sm:$0xff] }
  0x10   :  { %v29_v55 = vld [vmem:[%s2102_s0 + $0x60] sm:$0xff]  ;;  %v48_v56 = vld [vmem:[%s2102_s0 + $0xf8] sm:$0xff]  ;;  %v1577_v58 = vpack.c.bf16 %v484_v53, %v483_v52  ;;  %v30_v59 = vld [vmem:[%s2102_s0 + $0x68] sm:$0xff] }
  0x11   :  { %1552 = vmatpush3.bf16.msra.mxu0 %v1549_v12  ;;  %v49_v57 = vld [vmem:[%s2102_s0 + $0x100] sm:$0xff]  ;;  %v31_v60 = vld [vmem:[%s2102_s0 + $0x70] sm:$0xff]  ;;  %v50_v61 = vld [vmem:[%s2102_s0 + $0x108] sm:$0xff] }
  0x12   :  { %1624 = vmatpush3.bf16.msra.mxu1 %v1549_v12  ;;  %v51_v62 = vld [vmem:[%s2102_s0 + $0x110] sm:$0xff]  ;;  %v32_v63 = vld [vmem:[%s2102_s0 + $0x78] sm:$0xff]  ;;  %v33_v0 = vld [vmem:[%s2102_s0 + $0x80] sm:$0xff] }
  0x13   :  { %1554 = vmatprep.subr.bf16.mxu1 %v1553_v17  ;;  %v52_v1 = vld [vmem:[%s2102_s0 + $0x118] sm:$0xff]  ;;  %v53_v2 = vld [vmem:[%s2102_s0 + $0x120] sm:$0xff]  ;;  %v34_v3 = vld [vmem:[%s2102_s0 + $0x88] sm:$0xff] }
  0x14   :  { %1303 = vmatmul.mubr.msk.f32.vlgmr.msra.gmra.mrb[0].mxu0 %vm63_vm0, %v18_v16  ;;  %v35_v4 = vld [vmem:[%s2102_s0 + $0x90] sm:$0xff]  ;;  %v54_v5 = vld [vmem:[%s2102_s0 + $0x128] sm:$0xff]  ;;  %v36_v6 = vld [vmem:[%s2102_s0 + $0x98] sm:$0xff] }
  0x15   :  { %1305 = vmatprep.mubr.msk.f32.mxu0 %vm63_vm0, %v19_v20  ;;  %1333 = vmatmul.mubr.msk.f32.vlgmr.msra.gmra.mrb[0].mxu1 %vm63_vm0, %v38_v21  ;;  %v485_v7 = vld [vmem:[%s2103_s2 + $0x70] sm:$0xff]  ;;  %v486_v8 = vld [vmem:[%s2103_s2 + $0x78] sm:$0xff]  ;;  %v780_v10 = vld [vmem:[%s2104_s3] sm:$0xff] }
  0x16   :  { %1335 = vmatprep.mubr.msk.f32.mxu1 %vm63_vm0, %v39_v22  ;;  %1556 = vmatpush3.bf16.msra.mxu1 %v1553_v17  ;;  %v1581_v9 = vpack.c.bf16 %v486_v8, %v485_v7  ;;  %v781_v11 = vld [vmem:[%s2104_s3 + $0x8] sm:$0xff]  ;;  %v782_v12 = vld [vmem:[%s2104_s3 + $0x10] sm:$0xff]  ;;  %v783_v14 = vld [vmem:[%s2104_s3 + $0x18] sm:$0xff] }
  0x17   :  { %1558 = vmatprep.subr.bf16.mxu1 %v1557_v23  ;;  %v1585_v13 = vpack.c.bf16 %v781_v11, %v780_v10  ;;  %v1589_v15 = vpack.c.bf16 %v783_v14, %v782_v12  ;;  %v784_v16 = vld [vmem:[%s2104_s3 + $0x20] sm:$0xff]  ;;  %v785_v17 = vld [vmem:[%s2104_s3 + $0x28] sm:$0xff]  ;;  %v786_v19 = vld [vmem:[%s2104_s3 + $0x30] sm:$0xff] }
  0x18   :  { %1306 = vmatmul.mubr.msk.f32.gmra.mrb[2].mxu0 %vm63_vm0, %v20_v26  ;;  %v1593_v18 = vpack.c.bf16 %v785_v17, %v784_v16  ;;  %v787_v20 = vld [vmem:[%s2104_s3 + $0x38] sm:$0xff]  ;;  %v788_v22 = vld [vmem:[%s2104_s3 + $0x40] sm:$0xff]  ;;  %v790_v25 = vld [vmem:[%s2104_s3 + $0x50] sm:$0xff] }
  0x19   :  { %1308 = vmatprep.mubr.msk.f32.mxu0 %vm63_vm0, %v21_v27  ;;  %1336 = vmatmul.mubr.msk.f32.gmra.mrb[2].mxu1 %vm63_vm0, %v40_v28  ;;  %v1597_v21 = vpack.c.bf16 %v787_v20, %v786_v19  ;;  %v791_v26 = vld [vmem:[%s2104_s3 + $0x58] sm:$0xff]  ;;  %v792_v28 = vld [vmem:[%s2104_s3 + $0x60] sm:$0xff]  ;;  %v794_v31 = vld [vmem:[%s2104_s3 + $0x70] sm:$0xff] }
  0x1a   :  { %1338 = vmatprep.mubr.msk.f32.mxu1 %vm63_vm0, %v41_v29  ;;  %1560 = vmatpush3.bf16.msra.mxu1 %v1557_v23  ;;  %v789_v23 = vld [vmem:[%s2104_s3 + $0x48] sm:$0xff]  ;;  %v1605_v27 = vpack.c.bf16 %v791_v26, %v790_v25  ;;  %v795_v32 = vld [vmem:[%s2104_s3 + $0x78] sm:$0xff] }
  0x1b   :  { %1562 = vmatprep.subr.bf16.mxu1 %v1561_v30  ;;  %1586 = vmatprep.subr.bf16.mxu0 %v1585_v13  ;;  %v1601_v24 = vpack.c.bf16 %v789_v23, %v788_v22  ;;  %v793_v29 = vld [vmem:[%s2104_s3 + $0x68] sm:$0xff] }
  0x1c   :  { %1309 = vmatmul.mubr.msk.f32.gmra.mrb[4].mxu0 %vm63_vm0, %v22_v33  ;;  %v1613_v33 = vpack.c.bf16 %v795_v32, %v794_v31 }
  0x1d   :  { %1311 = vmatprep.mubr.msk.f32.mxu0 %vm63_vm0, %v23_v34  ;;  %1339 = vmatmul.mubr.msk.f32.gmra.mrb[4].mxu1 %vm63_vm0, %v42_v35 }
  0x1e   :  { %1341 = vmatprep.mubr.msk.f32.mxu1 %vm63_vm0, %v43_v36  ;;  %1564 = vmatpush3.bf16.msra.mxu1 %v1561_v30  ;;  %v1609_v30 = vpack.c.bf16 %v793_v29, %v792_v28 }
  0x1f   :  { %1566 = vmatprep.subr.bf16.mxu1 %v1565_v37  ;;  %1588 = vmatpush3.bf16.msra.mxu0 %v1585_v13 }
  0x20   :  { %1312 = vmatmul.mubr.msk.f32.gmra.mrb[6].mxu0 %vm63_vm0, %v24_v40  ;;  %1590 = vmatprep.subr.bf16.mxu0 %v1589_v15 }
  0x21   :  { %1314 = vmatprep.mubr.msk.f32.mxu0 %vm63_vm0, %v25_v41  ;;  %1342 = vmatmul.mubr.msk.f32.gmra.mrb[6].mxu1 %vm63_vm0, %v44_v42 }
  0x22   :  { %1344 = vmatprep.mubr.msk.f32.mxu1 %vm63_vm0, %v45_v43  ;;  %1568 = vmatpush3.bf16.msra.mxu1 %v1565_v37 }
  0x23   :  { %1570 = vmatprep.subr.bf16.mxu1 %v1569_v44  ;;  %1592 = vmatpush3.bf16.msra.mxu0 %v1589_v15 }
  0x24   :  { %1315 = vmatmul.mubr.msk.f32.gmra.mrb[8].mxu0 %vm63_vm0, %v26_v47  ;;  %1594 = vmatprep.subr.bf16.mxu0 %v1593_v18 }
  0x25   :  { %1317 = vmatprep.mubr.msk.f32.mxu0 %vm63_vm0, %v27_v48  ;;  %1345 = vmatmul.mubr.msk.f32.gmra.mrb[8].mxu1 %vm63_vm0, %v46_v49 }
  0x26   :  { %1347 = vmatprep.mubr.msk.f32.mxu1 %vm63_vm0, %v47_v50  ;;  %1572 = vmatpush3.bf16.msra.mxu1 %v1569_v44 }
  0x27   :  { %1574 = vmatprep.subr.bf16.mxu1 %v1573_v51  ;;  %1596 = vmatpush3.bf16.msra.mxu0 %v1593_v18 }
  0x28   :  { %1318 = vmatmul.mubr.msk.f32.gmra.mrb[10].mxu0 %vm63_vm0, %v28_v54  ;;  %1598 = vmatprep.subr.bf16.mxu0 %v1597_v21 }
  0x29   :  { %1320 = vmatprep.mubr.msk.f32.mxu0 %vm63_vm0, %v29_v55  ;;  %1348 = vmatmul.mubr.msk.f32.gmra.mrb[10].mxu1 %vm63_vm0, %v48_v56 }
  0x2a   :  { %1350 = vmatprep.mubr.msk.f32.mxu1 %vm63_vm0, %v49_v57  ;;  %1576 = vmatpush3.bf16.msra.mxu1 %v1573_v51 }
  0x2b   :  { %1578 = vmatprep.subr.bf16.mxu1 %v1577_v58  ;;  %1600 = vmatpush3.bf16.msra.mxu0 %v1597_v21 }
  0x2c   :  { %1321 = vmatmul.mubr.msk.f32.gmra.mrb[12].mxu0 %vm63_vm0, %v30_v59  ;;  %1602 = vmatprep.subr.bf16.mxu0 %v1601_v24 }
  0x2d   :  { %1323 = vmatprep.mubr.msk.f32.mxu0 %vm63_vm0, %v31_v60  ;;  %1351 = vmatmul.mubr.msk.f32.gmra.mrb[12].mxu1 %vm63_vm0, %v50_v61 }
  0x2e   :  { %1353 = vmatprep.mubr.msk.f32.mxu1 %vm63_vm0, %v51_v62  ;;  %1580 = vmatpush3.bf16.msra.mxu1 %v1577_v58 }
  0x2f   :  { %1582 = vmatprep.subr.bf16.mxu1 %v1581_v9  ;;  %1604 = vmatpush3.bf16.msra.mxu0 %v1601_v24 }
  0x30   :  { %1324 = vmatmul.mubr.msk.f32.gmra.mrb[14].mxu0 %vm63_vm0, %v32_v63  ;;  %1606 = vmatprep.subr.bf16.mxu0 %v1605_v27 }
  0x31   :  { %1326 = vmatprep.mubr.msk.f32.mxu0 %vm63_vm0, %v33_v0  ;;  %1354 = vmatmul.mubr.msk.f32.gmra.mrb[14].mxu1 %vm63_vm0, %v52_v1 }
  0x32   :  { %1356 = vmatprep.mubr.msk.f32.mxu1 %vm63_vm0, %v53_v2  ;;  %1584 = vmatpush3.bf16.msra.mxu1 %v1581_v9 }
  0x33   :  { %1608 = vmatpush3.bf16.msra.mxu0 %v1605_v27 }
  0x34   :  { %1327 = vmatmul.mubr.msk.f32.gmra.mrb[16].mxu0 %vm63_vm0, %v34_v3  ;;  %1610 = vmatprep.subr.bf16.mxu0 %v1609_v30 }
  0x35   :  { %1329 = vmatprep.mubr.msk.f32.mxu0 %vm63_vm0, %v35_v4  ;;  %1357 = vmatmul.mubr.msk.f32.gmra.mrb[16].mxu1 %vm63_vm0, %v54_v5 }
  0x37   :  { %1612 = vmatpush3.bf16.msra.mxu0 %v1609_v30 }
  0x38   :  { %1330 = vmatmul.mubr.msk.f32.gmra.mrb[18].mxu0 %vm63_vm0, %v36_v6  ;;  %1614 = vmatprep.subr.bf16.mxu0 %v1613_v33 }
  0x3b   :  { %1616 = vmatpush3.bf16.msra.mxu0 %v1613_v33 }
  0xe7   :  { %v1304_v34 = vpop.f32.mrb[0].mxu0 }
  0xe8   :  { %v244_v35 = vpop.f32.mrb[1].mxu0  ;;  %v1922_v36 = vpop.f32.mrb[0].mxu1  ;;  %v434_v39 = vmax.f32 %v1304_v34, 0.0 }
  0xe9   :  { %v433_v37 = vmax.f32 %v244_v35, 0.0  ;;  %v1924_v38 = vpop.f32.mrb[1].mxu1  ;;  %v454_v30 = vmax.f32 %v1922_v36, 0.0 }
  0xea   :  { %v453_v27 = vmax.f32 %v1924_v38, 0.0 }
  0xeb   :  { %v1307_v40 = vpop.f32.mrb[2].mxu0  ;;  %1391 = vmatprep.mubr.f32.mxu1 %v433_v37 }
  0xec   :  { %v254_v41 = vpop.f32.mrb[3].mxu0  ;;  %1392 = vmatmul.mubr.f32.vlgmr.msra.gmra.mrb[18].mxu1 %v434_v39  ;;  %v1926_v42 = vpop.f32.mrb[2].mxu1  ;;  %v436_v45 = vmax.f32 %v1307_v40, 0.0 }
  0xed   :  { %v435_v43 = vmax.f32 %v254_v41, 0.0  ;;  %v1928_v44 = vpop.f32.mrb[3].mxu1  ;;  %v456_v32 = vmax.f32 %v1926_v42, 0.0 }
  0xee   :  { %v455_v29 = vmax.f32 %v1928_v44, 0.0 }
  0xef   :  { %v1310_v46 = vpop.f32.mrb[4].mxu0  ;;  %1394 = vmatprep.mubr.f32.mxu1 %v435_v43 }
  0xf0   :  { %v264_v47 = vpop.f32.mrb[5].mxu0  ;;  %1395 = vmatmul.mubr.f32.gmra.mrb[20].mxu1 %v436_v45  ;;  %v1930_v48 = vpop.f32.mrb[4].mxu1  ;;  %v438_v51 = vmax.f32 %v1310_v46, 0.0 }
  0xf1   :  { %v437_v49 = vmax.f32 %v264_v47, 0.0  ;;  %v1932_v50 = vpop.f32.mrb[5].mxu1  ;;  %v458_v34 = vmax.f32 %v1930_v48, 0.0 }
  0xf2   :  { %v457_v31 = vmax.f32 %v1932_v50, 0.0 }
  0xf3   :  { %v1313_v52 = vpop.f32.mrb[6].mxu0  ;;  %1397 = vmatprep.mubr.f32.mxu1 %v437_v49 }
  0xf4   :  { %v274_v53 = vpop.f32.mrb[7].mxu0  ;;  %1398 = vmatmul.mubr.f32.gmra.mrb[22].mxu1 %v438_v51  ;;  %v1934_v54 = vpop.f32.mrb[6].mxu1  ;;  %v440_v57 = vmax.f32 %v1313_v52, 0.0 }
  0xf5   :  { %v439_v55 = vmax.f32 %v274_v53, 0.0  ;;  %v1936_v56 = vpop.f32.mrb[7].mxu1  ;;  %v460_v37 = vmax.f32 %v1934_v54, 0.0 }
  0xf6   :  { %v459_v33 = vmax.f32 %v1936_v56, 0.0 }
  0xf7   :  { %v1316_v58 = vpop.f32.mrb[8].mxu0  ;;  %1400 = vmatprep.mubr.f32.mxu1 %v439_v55 }
  0xf8   :  { %v284_v59 = vpop.f32.mrb[9].mxu0  ;;  %1401 = vmatmul.mubr.f32.gmra.mrb[24].mxu1 %v440_v57  ;;  %v1938_v60 = vpop.f32.mrb[8].mxu1  ;;  %v442_v63 = vmax.f32 %v1316_v58, 0.0 }
  0xf9   :  { %v441_v61 = vmax.f32 %v284_v59, 0.0  ;;  %v384_v62 = vpop.f32.mrb[9].mxu1  ;;  %v462_v38 = vmax.f32 %v1938_v60, 0.0 }
  0xfa   :  { %v461_v35 = vmax.f32 %v384_v62, 0.0 }
  0xfb   :  { %v1319_v0 = vpop.f32.mrb[10].mxu0  ;;  %1403 = vmatprep.mubr.f32.mxu1 %v441_v61 }
  0xfc   :  { %v294_v1 = vpop.f32.mrb[11].mxu0  ;;  %1404 = vmatmul.mubr.f32.gmra.mrb[26].mxu1 %v442_v63  ;;  %v1349_v2 = vpop.f32.mrb[10].mxu1  ;;  %v444_v5 = vmax.f32 %v1319_v0, 0.0 }
  0xfd   :  { %v443_v3 = vmax.f32 %v294_v1, 0.0  ;;  %v394_v4 = vpop.f32.mrb[11].mxu1  ;;  %v464_v40 = vmax.f32 %v1349_v2, 0.0 }
  0xfe   :  { %v463_v36 = vmax.f32 %v394_v4, 0.0 }
  0xff   :  { %v1322_v6 = vpop.f32.mrb[12].mxu0  ;;  %1406 = vmatprep.mubr.f32.mxu1 %v443_v3 }
 0x100   :  { %v304_v7 = vpop.f32.mrb[13].mxu0  ;;  %1407 = vmatmul.mubr.f32.gmra.mrb[28].mxu1 %v444_v5  ;;  %v1352_v8 = vpop.f32.mrb[12].mxu1  ;;  %v446_v11 = vmax.f32 %v1322_v6, 0.0 }
 0x101   :  { %v445_v9 = vmax.f32 %v304_v7, 0.0  ;;  %v404_v10 = vpop.f32.mrb[13].mxu1  ;;  %v466_v42 = vmax.f32 %v1352_v8, 0.0 }
 0x102   :  { %v465_v39 = vmax.f32 %v404_v10, 0.0 }
 0x103   :  { %v1325_v12 = vpop.f32.mrb[14].mxu0  ;;  %1409 = vmatprep.mubr.f32.mxu1 %v445_v9 }
 0x104   :  { %v314_v13 = vpop.f32.mrb[15].mxu0  ;;  %1410 = vmatmul.mubr.f32.gmra.mrb[30].mxu1 %v446_v11  ;;  %v1355_v14 = vpop.f32.mrb[14].mxu1  ;;  %v448_v17 = vmax.f32 %v1325_v12, 0.0 }
 0x105   :  { %v447_v15 = vmax.f32 %v314_v13, 0.0  ;;  %v414_v16 = vpop.f32.mrb[15].mxu1  ;;  %v468_v44 = vmax.f32 %v1355_v14, 0.0 }
 0x106   :  { %v467_v41 = vmax.f32 %v414_v16, 0.0 }
 0x107   :  { %v1328_v18 = vpop.f32.mrb[16].mxu0  ;;  %1412 = vmatprep.mubr.f32.mxu1 %v447_v15 }
 0x108   :  { %v324_v19 = vpop.f32.mrb[17].mxu0  ;;  %1413 = vmatmul.mubr.f32.gmra.mrb[32].mxu1 %v448_v17  ;;  %v1358_v20 = vpop.f32.mrb[16].mxu1  ;;  %v450_v23 = vmax.f32 %v1328_v18, 0.0 }
 0x109   :  { %v449_v21 = vmax.f32 %v324_v19, 0.0  ;;  %v424_v22 = vpop.f32.mrb[17].mxu1  ;;  %v470_v45 = vmax.f32 %v1358_v20, 0.0 }
 0x10a   :  { %v469_v43 = vmax.f32 %v424_v22, 0.0 }
 0x10b   :  { %v1331_v24 = vpop.f32.mrb[18].mxu0  ;;  %1415 = vmatprep.mubr.f32.mxu1 %v449_v21 }
 0x10c   :  { %v334_v25 = vpop.f32.mrb[19].mxu0  ;;  %1416 = vmatmul.mubr.f32.gmra.mrb[34].mxu1 %v450_v23  ;;  %v452_v28 = vmax.f32 %v1331_v24, 0.0 }
 0x10d   :  { %v451_v26 = vmax.f32 %v334_v25, 0.0 }
 0x10f   :  { %1418 = vmatprep.mubr.f32.mxu1 %v451_v26 }
 0x110   :  { %1419 = vmatmul.mubr.f32.gmra.mrb[36].mxu1 %v452_v28 }
 0x111   :  { %1421 = vmatprep.mubr.f32.mxu1 %v453_v27 }
 0x114   :  { %1422 = vmatmul.mubr.f32.gmra.mrb[38].mxu1 %v454_v30 }
 0x115   :  { %1424 = vmatprep.mubr.f32.mxu1 %v455_v29 }
 0x118   :  { %1425 = vmatmul.mubr.f32.gmra.mrb[40].mxu1 %v456_v32 }
 0x119   :  { %1427 = vmatprep.mubr.f32.mxu1 %v457_v31 }
 0x11c   :  { %1428 = vmatmul.mubr.f32.gmra.mrb[42].mxu1 %v458_v34 }
 0x11d   :  { %1430 = vmatprep.mubr.f32.mxu1 %v459_v33 }
 0x120   :  { %1431 = vmatmul.mubr.f32.gmra.mrb[44].mxu1 %v460_v37 }
 0x121   :  { %1433 = vmatprep.mubr.f32.mxu1 %v461_v35 }
 0x124   :  { %1434 = vmatmul.mubr.f32.gmra.mrb[46].mxu1 %v462_v38 }
 0x125   :  { %1436 = vmatprep.mubr.f32.mxu1 %v463_v36 }
 0x128   :  { %1437 = vmatmul.mubr.f32.gmra.mrb[48].mxu1 %v464_v40 }
 0x129   :  { %1439 = vmatprep.mubr.f32.mxu1 %v465_v39 }
 0x12c   :  { %1440 = vmatmul.mubr.f32.gmra.mrb[50].mxu1 %v466_v42 }
 0x12d   :  { %1442 = vmatprep.mubr.f32.mxu1 %v467_v41 }
 0x130   :  { %1443 = vmatmul.mubr.f32.gmra.mrb[52].mxu1 %v468_v44 }
 0x131   :  { %1445 = vmatprep.mubr.f32.mxu1 %v469_v43 }
 0x134   :  { %1446 = vmatmul.mubr.f32.gmra.mrb[54].mxu1 %v470_v45 }
 0x1bf   :  { %v1393_v46 = vpop.f32.mrb[18].mxu1 }
 0x1c0   :  { %v553_v47 = vpop.f32.mrb[19].mxu1  ;;  %v743_v49 = vmax.f32 %v1393_v46, 0.0 }
 0x1c1   :  { %v742_v48 = vmax.f32 %v553_v47, 0.0 }
 0x1c3   :  { %v1396_v50 = vpop.f32.mrb[20].mxu1  ;;  %1480 = vmatprep.mubr.f32.mxu0 %v742_v48 }
 0x1c4   :  { %v563_v51 = vpop.f32.mrb[21].mxu1  ;;  %1481 = vmatmul.mubr.f32.vlgmr.msra.gmra.mrb[20].mxu0 %v743_v49  ;;  %v745_v53 = vmax.f32 %v1396_v50, 0.0 }
 0x1c5   :  { %v744_v52 = vmax.f32 %v563_v51, 0.0 }
 0x1c7   :  { %v1399_v54 = vpop.f32.mrb[22].mxu1  ;;  %1483 = vmatprep.mubr.f32.mxu0 %v744_v52 }
 0x1c8   :  { %v573_v55 = vpop.f32.mrb[23].mxu1  ;;  %1484 = vmatmul.mubr.f32.gmra.mrb[22].mxu0 %v745_v53  ;;  %v747_v57 = vmax.f32 %v1399_v54, 0.0 }
 0x1c9   :  { %v746_v56 = vmax.f32 %v573_v55, 0.0 }
 0x1cb   :  { %v1402_v58 = vpop.f32.mrb[24].mxu1  ;;  %1486 = vmatprep.mubr.f32.mxu0 %v746_v56 }
 0x1cc   :  { %v583_v59 = vpop.f32.mrb[25].mxu1  ;;  %1487 = vmatmul.mubr.f32.gmra.mrb[24].mxu0 %v747_v57  ;;  %v749_v61 = vmax.f32 %v1402_v58, 0.0 }
 0x1cd   :  { %v748_v60 = vmax.f32 %v583_v59, 0.0 }
 0x1cf   :  { %v1405_v62 = vpop.f32.mrb[26].mxu1  ;;  %1489 = vmatprep.mubr.f32.mxu0 %v748_v60 }
 0x1d0   :  { %v593_v63 = vpop.f32.mrb[27].mxu1  ;;  %1490 = vmatmul.mubr.f32.gmra.mrb[26].mxu0 %v749_v61  ;;  %v751_v1 = vmax.f32 %v1405_v62, 0.0 }
 0x1d1   :  { %v750_v0 = vmax.f32 %v593_v63, 0.0 }
 0x1d3   :  { %v1408_v2 = vpop.f32.mrb[28].mxu1  ;;  %1492 = vmatprep.mubr.f32.mxu0 %v750_v0 }
 0x1d4   :  { %v603_v3 = vpop.f32.mrb[29].mxu1  ;;  %1493 = vmatmul.mubr.f32.gmra.mrb[28].mxu0 %v751_v1  ;;  %v753_v5 = vmax.f32 %v1408_v2, 0.0 }
 0x1d5   :  { %v752_v4 = vmax.f32 %v603_v3, 0.0 }
 0x1d7   :  { %v1411_v6 = vpop.f32.mrb[30].mxu1  ;;  %1495 = vmatprep.mubr.f32.mxu0 %v752_v4 }
 0x1d8   :  { %v613_v7 = vpop.f32.mrb[31].mxu1  ;;  %1496 = vmatmul.mubr.f32.gmra.mrb[30].mxu0 %v753_v5  ;;  %v755_v9 = vmax.f32 %v1411_v6, 0.0 }
 0x1d9   :  { %v754_v8 = vmax.f32 %v613_v7, 0.0 }
 0x1db   :  { %v1414_v10 = vpop.f32.mrb[32].mxu1  ;;  %1498 = vmatprep.mubr.f32.mxu0 %v754_v8 }
 0x1dc   :  { %v623_v11 = vpop.f32.mrb[33].mxu1  ;;  %1499 = vmatmul.mubr.f32.gmra.mrb[32].mxu0 %v755_v9  ;;  %v757_v13 = vmax.f32 %v1414_v10, 0.0 }
 0x1dd   :  { %v756_v12 = vmax.f32 %v623_v11, 0.0 }
 0x1df   :  { %v1417_v14 = vpop.f32.mrb[34].mxu1  ;;  %1501 = vmatprep.mubr.f32.mxu0 %v756_v12 }
 0x1e0   :  { %v633_v15 = vpop.f32.mrb[35].mxu1  ;;  %1502 = vmatmul.mubr.f32.gmra.mrb[34].mxu0 %v757_v13  ;;  %v759_v17 = vmax.f32 %v1417_v14, 0.0 }
 0x1e1   :  { %v758_v16 = vmax.f32 %v633_v15, 0.0 }
 0x1e3   :  { %v1420_v18 = vpop.f32.mrb[36].mxu1  ;;  %1504 = vmatprep.mubr.f32.mxu0 %v758_v16 }
 0x1e4   :  { %v643_v19 = vpop.f32.mrb[37].mxu1  ;;  %1505 = vmatmul.mubr.f32.gmra.mrb[36].mxu0 %v759_v17  ;;  %v761_v21 = vmax.f32 %v1420_v18, 0.0 }
 0x1e5   :  { %v760_v20 = vmax.f32 %v643_v19, 0.0 }
 0x1e7   :  { %v1423_v22 = vpop.f32.mrb[38].mxu1  ;;  %1507 = vmatprep.mubr.f32.mxu0 %v760_v20 }
 0x1e8   :  { %v653_v23 = vpop.f32.mrb[39].mxu1  ;;  %1508 = vmatmul.mubr.f32.gmra.mrb[38].mxu0 %v761_v21  ;;  %v763_v25 = vmax.f32 %v1423_v22, 0.0 }
 0x1e9   :  { %v762_v24 = vmax.f32 %v653_v23, 0.0 }
 0x1eb   :  { %v1426_v26 = vpop.f32.mrb[40].mxu1  ;;  %1510 = vmatprep.mubr.f32.mxu0 %v762_v24 }
 0x1ec   :  { %v663_v27 = vpop.f32.mrb[41].mxu1  ;;  %1511 = vmatmul.mubr.f32.gmra.mrb[40].mxu0 %v763_v25  ;;  %v765_v29 = vmax.f32 %v1426_v26, 0.0 }
 0x1ed   :  { %v764_v28 = vmax.f32 %v663_v27, 0.0 }
 0x1ef   :  { %v1429_v30 = vpop.f32.mrb[42].mxu1  ;;  %1513 = vmatprep.mubr.f32.mxu0 %v764_v28 }
 0x1f0   :  { %v673_v31 = vpop.f32.mrb[43].mxu1  ;;  %1514 = vmatmul.mubr.f32.gmra.mrb[42].mxu0 %v765_v29  ;;  %v767_v33 = vmax.f32 %v1429_v30, 0.0 }
 0x1f1   :  { %v766_v32 = vmax.f32 %v673_v31, 0.0 }
 0x1f3   :  { %v1432_v34 = vpop.f32.mrb[44].mxu1  ;;  %1516 = vmatprep.mubr.f32.mxu0 %v766_v32 }
 0x1f4   :  { %v683_v35 = vpop.f32.mrb[45].mxu1  ;;  %1517 = vmatmul.mubr.f32.gmra.mrb[44].mxu0 %v767_v33  ;;  %v769_v36 = vmax.f32 %v1432_v34, 0.0 }
 0x1f5   :  { %v768_v37 = vmax.f32 %v683_v35, 0.0 }
 0x1f7   :  { %v1435_v38 = vpop.f32.mrb[46].mxu1  ;;  %1519 = vmatprep.mubr.f32.mxu0 %v768_v37 }
 0x1f8   :  { %v693_v39 = vpop.f32.mrb[47].mxu1  ;;  %1520 = vmatmul.mubr.f32.gmra.mrb[46].mxu0 %v769_v36  ;;  %v771_v41 = vmax.f32 %v1435_v38, 0.0 }
 0x1f9   :  { %v770_v40 = vmax.f32 %v693_v39, 0.0 }
 0x1fb   :  { %v1438_v42 = vpop.f32.mrb[48].mxu1  ;;  %1522 = vmatprep.mubr.f32.mxu0 %v770_v40 }
 0x1fc   :  { %v703_v43 = vpop.f32.mrb[49].mxu1  ;;  %1523 = vmatmul.mubr.f32.gmra.mrb[48].mxu0 %v771_v41  ;;  %v773_v45 = vmax.f32 %v1438_v42, 0.0 }
 0x1fd   :  { %v772_v44 = vmax.f32 %v703_v43, 0.0 }
 0x1ff   :  { %v1441_v46 = vpop.f32.mrb[50].mxu1  ;;  %1525 = vmatprep.mubr.f32.mxu0 %v772_v44 }
 0x200   :  { %v713_v47 = vpop.f32.mrb[51].mxu1  ;;  %1526 = vmatmul.mubr.f32.gmra.mrb[50].mxu0 %v773_v45  ;;  %v775_v49 = vmax.f32 %v1441_v46, 0.0 }
 0x201   :  { %v774_v48 = vmax.f32 %v713_v47, 0.0 }
 0x203   :  { %v1444_v50 = vpop.f32.mrb[52].mxu1  ;;  %1528 = vmatprep.mubr.f32.mxu0 %v774_v48 }
 0x204   :  { %v723_v51 = vpop.f32.mrb[53].mxu1  ;;  %1529 = vmatmul.mubr.f32.gmra.mrb[52].mxu0 %v775_v49  ;;  %v777_v53 = vmax.f32 %v1444_v50, 0.0 }
 0x205   :  { %v776_v52 = vmax.f32 %v723_v51, 0.0 }
 0x207   :  { %v1447_v54 = vpop.f32.mrb[54].mxu1  ;;  %1531 = vmatprep.mubr.f32.mxu0 %v776_v52 }
 0x208   :  { %v733_v55 = vpop.f32.mrb[55].mxu1  ;;  %1532 = vmatmul.mubr.f32.gmra.mrb[54].mxu0 %v777_v53  ;;  %v779_v57 = vmax.f32 %v1447_v54, 0.0 }
 0x209   :  { %v778_v56 = vmax.f32 %v733_v55, 0.0 }
 0x20b   :  { %1534 = vmatprep.mubr.f32.mxu0 %v778_v56 }
 0x20c   :  { %1535 = vmatmul.mubr.f32.gmra.mrb[56].mxu0 %v779_v57 }
 0x297   :  { %v1482_v58 = vpop.f32.mrb[20].mxu0 }
 0x298   :  { %1053 = vst.msk [vmem:[%s2105_s4 + $0x8] sm:$0xff] %vm1051_vm1, %v1482_v58  ;;  %v862_v59 = vpop.f32.mrb[21].mxu0 }
 0x299   :  { %1052 = vst.msk [vmem:[%s2105_s4] sm:$0xff] %vm1051_vm1, %v862_v59 }
 0x29b   :  { %v1485_v60 = vpop.f32.mrb[22].mxu0 }
 0x29c   :  { %1055 = vst.msk [vmem:[%s2105_s4 + $0x18] sm:$0xff] %vm1051_vm1, %v1485_v60  ;;  %v872_v61 = vpop.f32.mrb[23].mxu0 }
 0x29d   :  { %1054 = vst.msk [vmem:[%s2105_s4 + $0x10] sm:$0xff] %vm1051_vm1, %v872_v61 }
 0x29f   :  { %v1488_v62 = vpop.f32.mrb[24].mxu0 }
 0x2a0   :  { %1057 = vst.msk [vmem:[%s2105_s4 + $0x28] sm:$0xff] %vm1051_vm1, %v1488_v62  ;;  %v882_v63 = vpop.f32.mrb[25].mxu0 }
 0x2a1   :  { %1056 = vst.msk [vmem:[%s2105_s4 + $0x20] sm:$0xff] %vm1051_vm1, %v882_v63 }
 0x2a3   :  { %v1491_v0 = vpop.f32.mrb[26].mxu0 }
 0x2a4   :  { %1059 = vst.msk [vmem:[%s2105_s4 + $0x38] sm:$0xff] %vm1051_vm1, %v1491_v0  ;;  %v892_v1 = vpop.f32.mrb[27].mxu0 }
 0x2a5   :  { %1058 = vst.msk [vmem:[%s2105_s4 + $0x30] sm:$0xff] %vm1051_vm1, %v892_v1 }
 0x2a7   :  { %v1494_v2 = vpop.f32.mrb[28].mxu0 }
 0x2a8   :  { %1061 = vst.msk [vmem:[%s2105_s4 + $0x48] sm:$0xff] %vm1051_vm1, %v1494_v2  ;;  %v902_v3 = vpop.f32.mrb[29].mxu0 }
 0x2a9   :  { %1060 = vst.msk [vmem:[%s2105_s4 + $0x40] sm:$0xff] %vm1051_vm1, %v902_v3 }
 0x2ab   :  { %v1497_v4 = vpop.f32.mrb[30].mxu0 }
 0x2ac   :  { %1063 = vst.msk [vmem:[%s2105_s4 + $0x58] sm:$0xff] %vm1051_vm1, %v1497_v4  ;;  %v912_v5 = vpop.f32.mrb[31].mxu0 }
 0x2ad   :  { %1062 = vst.msk [vmem:[%s2105_s4 + $0x50] sm:$0xff] %vm1051_vm1, %v912_v5 }
 0x2af   :  { %v1500_v6 = vpop.f32.mrb[32].mxu0 }
 0x2b0   :  { %1065 = vst.msk [vmem:[%s2105_s4 + $0x68] sm:$0xff] %vm1051_vm1, %v1500_v6  ;;  %v922_v7 = vpop.f32.mrb[33].mxu0 }
 0x2b1   :  { %1064 = vst.msk [vmem:[%s2105_s4 + $0x60] sm:$0xff] %vm1051_vm1, %v922_v7 }
 0x2b3   :  { %v1503_v8 = vpop.f32.mrb[34].mxu0 }
 0x2b4   :  { %1067 = vst.msk [vmem:[%s2105_s4 + $0x78] sm:$0xff] %vm1051_vm1, %v1503_v8  ;;  %v932_v9 = vpop.f32.mrb[35].mxu0 }
 0x2b5   :  { %1066 = vst.msk [vmem:[%s2105_s4 + $0x70] sm:$0xff] %vm1051_vm1, %v932_v9 }
 0x2b7   :  { %v1506_v10 = vpop.f32.mrb[36].mxu0 }
 0x2b8   :  { %1069 = vst.msk [vmem:[%s2105_s4 + $0x88] sm:$0xff] %vm1051_vm1, %v1506_v10  ;;  %v942_v11 = vpop.f32.mrb[37].mxu0 }
 0x2b9   :  { %1068 = vst.msk [vmem:[%s2105_s4 + $0x80] sm:$0xff] %vm1051_vm1, %v942_v11 }
 0x2bb   :  { %v1509_v12 = vpop.f32.mrb[38].mxu0 }
 0x2bc   :  { %1071 = vst.msk [vmem:[%s2105_s4 + $0x98] sm:$0xff] %vm1051_vm1, %v1509_v12  ;;  %v952_v13 = vpop.f32.mrb[39].mxu0 }
 0x2bd   :  { %1070 = vst.msk [vmem:[%s2105_s4 + $0x90] sm:$0xff] %vm1051_vm1, %v952_v13 }
 0x2bf   :  { %v1512_v14 = vpop.f32.mrb[40].mxu0 }
 0x2c0   :  { %1073 = vst.msk [vmem:[%s2105_s4 + $0xa8] sm:$0xff] %vm1051_vm1, %v1512_v14  ;;  %v962_v15 = vpop.f32.mrb[41].mxu0 }
 0x2c1   :  { %1072 = vst.msk [vmem:[%s2105_s4 + $0xa0] sm:$0xff] %vm1051_vm1, %v962_v15 }
 0x2c3   :  { %v1515_v16 = vpop.f32.mrb[42].mxu0 }
 0x2c4   :  { %1075 = vst.msk [vmem:[%s2105_s4 + $0xb8] sm:$0xff] %vm1051_vm1, %v1515_v16  ;;  %v972_v17 = vpop.f32.mrb[43].mxu0 }
 0x2c5   :  { %1074 = vst.msk [vmem:[%s2105_s4 + $0xb0] sm:$0xff] %vm1051_vm1, %v972_v17 }
 0x2c7   :  { %v1518_v18 = vpop.f32.mrb[44].mxu0 }
 0x2c8   :  { %1077 = vst.msk [vmem:[%s2105_s4 + $0xc8] sm:$0xff] %vm1051_vm1, %v1518_v18  ;;  %v982_v19 = vpop.f32.mrb[45].mxu0 }
 0x2c9   :  { %1076 = vst.msk [vmem:[%s2105_s4 + $0xc0] sm:$0xff] %vm1051_vm1, %v982_v19 }
 0x2cb   :  { %v1521_v20 = vpop.f32.mrb[46].mxu0 }
 0x2cc   :  { %1079 = vst.msk [vmem:[%s2105_s4 + $0xd8] sm:$0xff] %vm1051_vm1, %v1521_v20  ;;  %v992_v21 = vpop.f32.mrb[47].mxu0 }
 0x2cd   :  { %1078 = vst.msk [vmem:[%s2105_s4 + $0xd0] sm:$0xff] %vm1051_vm1, %v992_v21 }
 0x2cf   :  { %v1524_v22 = vpop.f32.mrb[48].mxu0 }
 0x2d0   :  { %1081 = vst.msk [vmem:[%s2105_s4 + $0xe8] sm:$0xff] %vm1051_vm1, %v1524_v22  ;;  %v1002_v23 = vpop.f32.mrb[49].mxu0 }
 0x2d1   :  { %1080 = vst.msk [vmem:[%s2105_s4 + $0xe0] sm:$0xff] %vm1051_vm1, %v1002_v23 }
 0x2d3   :  { %v1527_v24 = vpop.f32.mrb[50].mxu0 }
 0x2d4   :  { %1083 = vst.msk [vmem:[%s2105_s4 + $0xf8] sm:$0xff] %vm1051_vm1, %v1527_v24  ;;  %v1012_v25 = vpop.f32.mrb[51].mxu0 }
 0x2d5   :  { %1082 = vst.msk [vmem:[%s2105_s4 + $0xf0] sm:$0xff] %vm1051_vm1, %v1012_v25 }
 0x2d7   :  { %v1530_v26 = vpop.f32.mrb[52].mxu0 }
 0x2d8   :  { %1085 = vst.msk [vmem:[%s2105_s4 + $0x108] sm:$0xff] %vm1051_vm1, %v1530_v26  ;;  %v1022_v27 = vpop.f32.mrb[53].mxu0 }
 0x2d9   :  { %1084 = vst.msk [vmem:[%s2105_s4 + $0x100] sm:$0xff] %vm1051_vm1, %v1022_v27 }
 0x2db   :  { %v1533_v28 = vpop.f32.mrb[54].mxu0 }
 0x2dc   :  { %1087 = vst.msk [vmem:[%s2105_s4 + $0x118] sm:$0xff] %vm1051_vm1, %v1533_v28  ;;  %v1032_v29 = vpop.f32.mrb[55].mxu0 }
 0x2dd   :  { %1086 = vst.msk [vmem:[%s2105_s4 + $0x110] sm:$0xff] %vm1051_vm1, %v1032_v29 }
 0x2df   :  { %v1536_v30 = vpop.f32.mrb[56].mxu0 }
 0x2e0   :  { %1089 = vst.msk [vmem:[%s2105_s4 + $0x128] sm:$0xff] %vm1051_vm1, %v1536_v30  ;;  %v1042_v31 = vpop.f32.mrb[57].mxu0 }
 0x2e1   :  { %1088 = vst.msk [vmem:[%s2105_s4 + $0x120] sm:$0xff] %vm1051_vm1, %v1042_v31 }

</bundles_post_ra>
